<compile_context>
chip_gen: v5e
topology: v5e:2x2
jax: 0.10.0
libtpu: 0.0.40
codegen_flags: <defaults>
</compile_context>

<pallas_src>
import functools

import jax
import jax.numpy as jnp
from jax.experimental import pallas as pl
from jax.experimental.pallas import tpu as pltpu


def cnn2l_attn_kernel(xp_ref, w1_ref, b1_ref, w2_ref, b2_ref,
                      wa_ref, ba_ref, va_ref, bv_ref, wc_ref, bc_ref,
                      o_ref, y1p_scr, *, k, approx_recip):
    TB, Lp, E = xp_ref.shape              # Lp = L + 2p (pre-padded in wrapper)
    p = k // 2
    L = Lp - 2 * p
    L2 = L // 2
    C1 = w1_ref.shape[1]
    C2 = w2_ref.shape[1]

    xp = xp_ref[...]                                          # (TB, L+2p, E)

    # ---- conv1 (E -> C1): im2col (lane-axis concat of k shifts) + one matmul ----
    xcol = jnp.concatenate([xp[:, t:t + L, :] for t in range(k)],
                           axis=-1).reshape(TB * L, k * E)     # (TB*L, k*E)
    acc1 = jnp.dot(xcol, w1_ref[...], preferred_element_type=jnp.float32)
    y1 = jnp.maximum(acc1 + b1_ref[...], 0.0)                  # (TB*L, C1) f32

    # ---- MaxPool1d(kernel=2, stride=2): reshape + single VPU max ----
    # L is even, so (2i, 2i+1) pairs never straddle samples.
    y1p = jnp.max(y1.reshape(TB * L2, 2, C1), axis=1)          # (TB*L2, C1)

    # ---- conv2 (C1 -> C2): zero-padded VMEM scratch + im2col + one matmul ----
    # Zero the whole slab each step (cheap; keeps pad rows correct regardless of
    # which core / grid step last touched the persistent scratch).
    y1p_scr[...] = jnp.zeros_like(y1p_scr)
    y1p_scr[:, p:p + L2, :] = y1p.reshape(TB, L2, C1).astype(y1p_scr.dtype)
    yp = y1p_scr[...]                                          # (TB, L2+2p, C1)
    ycol = jnp.concatenate([yp[:, t:t + L2, :] for t in range(k)],
                           axis=-1).reshape(TB * L2, k * C1)
    acc2 = jnp.dot(ycol, w2_ref[...], preferred_element_type=jnp.float32)
    y2 = jnp.maximum(acc2 + b2_ref[...], 0.0)                  # (TB*L2, C2) f32

    # ---- attention pooling (softmax over the sequence, per sample) ----
    a = jnp.tanh(jnp.dot(y2.astype(wa_ref.dtype), wa_ref[...],
                         preferred_element_type=jnp.float32) + ba_ref[...])
    s = jnp.dot(a.astype(va_ref.dtype), va_ref[...],
                preferred_element_type=jnp.float32) + bv_ref[...]   # (TB*L2, 1)
    s3 = s.reshape(TB, L2, 1)
    m = jnp.max(s3, axis=1, keepdims=True)                     # (TB, 1, 1)
    e = jnp.exp(s3 - m)                                        # (TB, L2, 1)
    denom = jnp.sum(e, axis=1, keepdims=True)                  # (TB, 1, 1)
    if approx_recip:
        w = e * pl.reciprocal(denom, approx=True)              # EUP slot (bf16 path)
    else:
        w = e / denom                                          # exact (f32 path)
    attended = jnp.sum(y2.reshape(TB, L2, C2) * w, axis=1)     # (TB, C2)

    # ---- classifier ----
    out = jnp.dot(attended.astype(wc_ref.dtype), wc_ref[...],
                  preferred_element_type=jnp.float32) + bc_ref[...]  # (TB, NC)
    o_ref[...] = out.astype(o_ref.dtype)


def cnn2l_attention_pooling(emb_x, params, *, block_b=None,
                            compute_dtype=jnp.float32):
    """emb_x: (B, L, E) float32 (embedding lookup already applied — glue).

    block_b: samples per grid step; defaults to the whole batch (optimal at toy
      shapes).  At scale choose block_b so block_b*L >= 128 (v5e) / 256 (v6e,
      v7x) and budget 2x double-buffered tiles against v7x's 64 MiB VMEM
      (raise vmem_limit_bytes if pushing block_b high).
    compute_dtype: jnp.float32 or jnp.bfloat16 (v6e/v7x MXU) for inputs and
      weights; accumulation is always f32.
    """
    B, L, E = emb_x.shape
    w1, b1, w2, b2, wa, ba, va, bv, wc, bc = params
    k, _, C1 = w1.shape
    C2 = w2.shape[2]
    A = wa.shape[1]
    NC = wc.shape[1]
    p = k // 2
    L2 = L // 2
    assert L % 2 == 0 and k % 2 == 1  # MaxPool1d(2,2) floor + 'same' conv assumptions

    TB = B if block_b is None else block_b
    assert B % TB == 0

    cdt = jnp.dtype(compute_dtype)
    f32 = jnp.float32
    # Pad the sequence once in XLA (no in-kernel sublane concatenation).
    xpad = jnp.pad(emb_x, ((0, 0), (p, p), (0, 0))).astype(cdt)   # (B, L+2p, E)
    args = (
        xpad,
        w1.reshape(k * E, C1).astype(cdt),    # im2col-flattened conv1 weight
        b1.astype(f32),
        w2.reshape(k * C1, C2).astype(cdt),   # im2col-flattened conv2 weight
        b2.astype(f32),
        wa.astype(cdt), ba.astype(f32),
        va.astype(cdt), bv.astype(f32),
        wc.astype(cdt), bc.astype(f32),
    )

    zero2 = lambda b: (0, 0)
    in_specs = [
        pl.BlockSpec((TB, L + 2 * p, E), lambda b: (b, 0, 0)),  # batched padded input
        pl.BlockSpec((k * E, C1), zero2),
        pl.BlockSpec((1, C1), zero2),
        pl.BlockSpec((k * C1, C2), zero2),
        pl.BlockSpec((1, C2), zero2),
        pl.BlockSpec((C2, A), zero2),
        pl.BlockSpec((1, A), zero2),
        pl.BlockSpec((A, 1), zero2),
        pl.BlockSpec((1, 1), zero2),
        pl.BlockSpec((C2, NC), zero2),
        pl.BlockSpec((1, NC), zero2),
    ]
    out_specs = pl.BlockSpec((TB, NC), lambda b: (b, 0))        # TB-row dense writeback

    kernel = functools.partial(
        cnn2l_attn_kernel, k=k,
        approx_recip=(cdt != jnp.dtype(jnp.float32)))

    return pl.pallas_call(
        kernel,
        grid=(B // TB,),
        in_specs=in_specs,
        out_specs=out_specs,
        out_shape=jax.ShapeDtypeStruct((B, NC), jnp.float32),
        scratch_shapes=[pltpu.VMEM((TB, L2 + 2 * p, C1), cdt)],  # padded conv2 input
        compiler_params=pltpu.CompilerParams(
            # "parallel" batch axis lets v7x shard grid steps across its 2 TCs;
            # harmless no-op on v5e/v6e.
            dimension_semantics=("parallel",)),
    )(*args)


def reference(emb_x, params):
    """Pure-JAX reference mirroring the PyTorch forward (eval mode)."""
    w1, b1, w2, b2, wa, ba, va, bv, wc, bc = params

    def conv1d(x, w, b):                       # x: (B, L, Cin), w: (k, Cin, Cout)
        k = w.shape[0]
        p = k // 2
        xp = jnp.pad(x, ((0, 0), (p, p), (0, 0)))
        out = sum(xp[:, t:t + x.shape[1], :] @ w[t] for t in range(k))
        return out + b

    y1 = jax.nn.relu(conv1d(emb_x, w1, b1))
    y1p = jnp.maximum(y1[:, 0::2, :], y1[:, 1::2, :])       # MaxPool1d(2, 2)
    y2 = jax.nn.relu(conv1d(y1p, w2, b2))
    a = jnp.tanh(y2 @ wa + ba)
    s = a @ va + bv
    attw = jax.nn.softmax(s, axis=1)
    attended = (y2 * attw).sum(axis=1)
    return attended @ wc + bc


if __name__ == "__main__":
    # Small, module-consistent shapes.
    num_categories, E, C1, C2, k, A, NC = 32, 8, 16, 16, 3, 8, 4
    B, L = 2, 16

    key = jax.random.PRNGKey(0)
    keys = jax.random.split(key, 12)

    # Deterministic synthetic parameters (PyTorch shapes permuted for NLC matmuls:
    # Conv1d (Cout,Cin,k) -> (k,Cin,Cout); Linear (out,in) -> transposed).
    emb_table = jax.random.normal(keys[0], (num_categories, E), jnp.float32) * 0.5
    w1 = jax.random.normal(keys[1], (k, E, C1), jnp.float32) * 0.2
    b1 = jax.random.normal(keys[2], (1, C1), jnp.float32) * 0.1
    w2 = jax.random.normal(keys[3], (k, C1, C2), jnp.float32) * 0.2
    b2 = jax.random.normal(keys[4], (1, C2), jnp.float32) * 0.1
    wa = jax.random.normal(keys[5], (C2, A), jnp.float32) * 0.2
    ba = jax.random.normal(keys[6], (1, A), jnp.float32) * 0.1
    va = jax.random.normal(keys[7], (A, 1), jnp.float32) * 0.2
    bv = jax.random.normal(keys[8], (1, 1), jnp.float32) * 0.1
    wc = jax.random.normal(keys[9], (C2, NC), jnp.float32) * 0.2
    bc = jax.random.normal(keys[10], (1, NC), jnp.float32) * 0.1
    params = (w1, b1, w2, b2, wa, ba, va, bv, wc, bc)

    # Integer token input (B, L); embedding lookup is plain-JAX glue.
    tokens = jax.random.randint(keys[11], (B, L), 0, num_categories, jnp.int32)
    emb_x = emb_table[tokens]                                # (B, L, E)

    ref = reference(emb_x, params)

    # f32 path (v5e-style): exact reciprocal, tight check.
    out_f32 = jax.block_until_ready(cnn2l_attention_pooling(emb_x, params))
    assert out_f32.shape == (B, NC)
    assert jnp.allclose(out_f32, ref, rtol=1e-4, atol=1e-4), (out_f32, ref)

    # bf16 path (v6e/v7x-style): bf16 inputs/weights, f32 accumulation,
    # approximate reciprocal -> looser tolerance.
    out_bf16 = jax.block_until_ready(
        cnn2l_attention_pooling(emb_x, params, compute_dtype=jnp.bfloat16))
    assert out_bf16.shape == (B, NC)
    assert jnp.allclose(out_bf16, ref, rtol=5e-2, atol=5e-2), (out_bf16, ref)

    print("KERNEL_OK")
</pallas_src>

<mosaic_0001>
module attributes {stable_mosaic.version = 11 : i64} {
  func.func @cnn2l_attn_kernel(%arg0: i32, %arg1: memref<2x18x8xf32, #tpu.memory_space<vmem>>, %arg2: memref<24x16xf32, #tpu.memory_space<vmem>>, %arg3: memref<1x16xf32, #tpu.memory_space<vmem>>, %arg4: memref<48x16xf32, #tpu.memory_space<vmem>>, %arg5: memref<1x16xf32, #tpu.memory_space<vmem>>, %arg6: memref<16x8xf32, #tpu.memory_space<vmem>>, %arg7: memref<1x8xf32, #tpu.memory_space<vmem>>, %arg8: memref<8x1xf32, #tpu.memory_space<vmem>>, %arg9: memref<1x1xf32, #tpu.memory_space<vmem>>, %arg10: memref<16x4xf32, #tpu.memory_space<vmem>>, %arg11: memref<1x4xf32, #tpu.memory_space<vmem>>, %arg12: memref<2x4xf32, #tpu.memory_space<vmem>>, %arg13: memref<2x10x16xf32, #tpu.memory_space<vmem>>) attributes {dimension_semantics = [#tpu.dimension_semantics<parallel>], iteration_bounds = array<i64: 1>, scalar_prefetch = 0 : i64, scratch_operands = 1 : i64, tpu.core_type = #tpu.core_type<tc>, window_params = [{transform_indices = @transform_0, window_bounds = array<i64: 2, 18, 8>}, {pipeline_mode = #tpu.pipeline_mode<synchronous>, transform_indices = @transform_1, window_bounds = array<i64: 24, 16>}, {pipeline_mode = #tpu.pipeline_mode<synchronous>, transform_indices = @transform_2, window_bounds = array<i64: 1, 16>}, {pipeline_mode = #tpu.pipeline_mode<synchronous>, transform_indices = @transform_3, window_bounds = array<i64: 48, 16>}, {pipeline_mode = #tpu.pipeline_mode<synchronous>, transform_indices = @transform_4, window_bounds = array<i64: 1, 16>}, {pipeline_mode = #tpu.pipeline_mode<synchronous>, transform_indices = @transform_5, window_bounds = array<i64: 16, 8>}, {pipeline_mode = #tpu.pipeline_mode<synchronous>, transform_indices = @transform_6, window_bounds = array<i64: 1, 8>}, {pipeline_mode = #tpu.pipeline_mode<synchronous>, transform_indices = @transform_7, window_bounds = array<i64: 8, 1>}, {pipeline_mode = #tpu.pipeline_mode<synchronous>, transform_indices = @transform_8, window_bounds = array<i64: 1, 1>}, {pipeline_mode = #tpu.pipeline_mode<synchronous>, transform_indices = @transform_9, window_bounds = array<i64: 16, 4>}, {pipeline_mode = #tpu.pipeline_mode<synchronous>, transform_indices = @transform_10, window_bounds = array<i64: 1, 4>}, {transform_indices = @transform_11, window_bounds = array<i64: 2, 4>}]} {
    %c0 = arith.constant 0 : index
    %c0_0 = arith.constant 0 : index
    %c0_1 = arith.constant 0 : index
    %0 = vector.load %arg1[%c0, %c0_0, %c0_1] : memref<2x18x8xf32, #tpu.memory_space<vmem>>, vector<2x18x8xf32>
    %1 = vector.extract_strided_slice %0 {offsets = [0, 0, 0], sizes = [2, 16, 8], strides = [1, 1, 1]} : vector<2x18x8xf32> to vector<2x16x8xf32>
    %2 = vector.extract_strided_slice %0 {offsets = [0, 1, 0], sizes = [2, 16, 8], strides = [1, 1, 1]} : vector<2x18x8xf32> to vector<2x16x8xf32>
    %3 = vector.extract_strided_slice %0 {offsets = [0, 2, 0], sizes = [2, 16, 8], strides = [1, 1, 1]} : vector<2x18x8xf32> to vector<2x16x8xf32>
    %4 = tpu.concatenate %1, %2, %3 in 2 : vector<2x16x8xf32>, vector<2x16x8xf32>, vector<2x16x8xf32> -> vector<2x16x24xf32>
    %5 = vector.shape_cast %4 : vector<2x16x24xf32> to vector<32x24xf32>
    %c0_2 = arith.constant 0 : index
    %c0_3 = arith.constant 0 : index
    %6 = vector.load %arg2[%c0_2, %c0_3] : memref<24x16xf32, #tpu.memory_space<vmem>>, vector<24x16xf32>
    %cst = arith.constant dense<0.000000e+00> : vector<32x16xf32>
    %7 = tpu.matmul %5, %6, %cst {dimension_numbers = #tpu.dot_dimension_numbers<[1], [0], [0], [1], [0, 0, 1, 1], [], []>} : vector<32x24xf32>, vector<24x16xf32>, vector<32x16xf32> -> vector<32x16xf32>
    %c0_4 = arith.constant 0 : index
    %c0_5 = arith.constant 0 : index
    %8 = vector.load %arg3[%c0_4, %c0_5] : memref<1x16xf32, #tpu.memory_space<vmem>>, vector<1x16xf32>
    %9 = vector.broadcast %8 : vector<1x16xf32> to vector<32x16xf32>
    %10 = arith.addf %7, %9 : vector<32x16xf32>
    %cst_6 = arith.constant 0.000000e+00 : f32
    %11 = vector.broadcast %cst_6 : f32 to vector<32x16xf32>
    %12 = arith.maximumf %10, %11 : vector<32x16xf32>
    %13 = vector.shape_cast %12 : vector<32x16xf32> to vector<16x2x16xf32>
    %cst_7 = arith.constant dense<0xFF800000> : vector<16x16xf32>
    %14 = vector.multi_reduction <maximumf>, %13, %cst_7 [1] : vector<16x2x16xf32> to vector<16x16xf32>
    %cst_8 = arith.constant 0.000000e+00 : f32
    %15 = vector.broadcast %cst_8 : f32 to vector<2x10x16xf32>
    %c0_9 = arith.constant 0 : index
    %c0_10 = arith.constant 0 : index
    %c0_11 = arith.constant 0 : index
    %16 = vector.load %arg13[%c0_9, %c0_10, %c0_11] : memref<2x10x16xf32, #tpu.memory_space<vmem>>, vector<2x10x16xf32>
    tpu.vector_store %arg13[%c0_9, %c0_10, %c0_11], %15 {strides = array<i32>} : memref<2x10x16xf32, #tpu.memory_space<vmem>>, vector<2x10x16xf32>,
    %17 = vector.shape_cast %14 : vector<16x16xf32> to vector<2x8x16xf32>
    %c0_12 = arith.constant 0 : index
    %c1 = arith.constant 1 : index
    %c0_13 = arith.constant 0 : index
    %18 = vector.load %arg13[%c0_12, %c1, %c0_13] : memref<2x10x16xf32, #tpu.memory_space<vmem>>, vector<2x8x16xf32>
    tpu.vector_store %arg13[%c0_12, %c1, %c0_13], %17 {strides = array<i32>} : memref<2x10x16xf32, #tpu.memory_space<vmem>>, vector<2x8x16xf32>,
    %c0_14 = arith.constant 0 : index
    %c0_15 = arith.constant 0 : index
    %c0_16 = arith.constant 0 : index
    %19 = vector.load %arg13[%c0_14, %c0_15, %c0_16] : memref<2x10x16xf32, #tpu.memory_space<vmem>>, vector<2x10x16xf32>
    %20 = vector.extract_strided_slice %19 {offsets = [0, 0, 0], sizes = [2, 8, 16], strides = [1, 1, 1]} : vector<2x10x16xf32> to vector<2x8x16xf32>
    %21 = vector.extract_strided_slice %19 {offsets = [0, 1, 0], sizes = [2, 8, 16], strides = [1, 1, 1]} : vector<2x10x16xf32> to vector<2x8x16xf32>
    %22 = vector.extract_strided_slice %19 {offsets = [0, 2, 0], sizes = [2, 8, 16], strides = [1, 1, 1]} : vector<2x10x16xf32> to vector<2x8x16xf32>
    %23 = tpu.concatenate %20, %21, %22 in 2 : vector<2x8x16xf32>, vector<2x8x16xf32>, vector<2x8x16xf32> -> vector<2x8x48xf32>
    %24 = vector.shape_cast %23 : vector<2x8x48xf32> to vector<16x48xf32>
    %c0_17 = arith.constant 0 : index
    %c0_18 = arith.constant 0 : index
    %25 = vector.load %arg4[%c0_17, %c0_18] : memref<48x16xf32, #tpu.memory_space<vmem>>, vector<48x16xf32>
    %cst_19 = arith.constant dense<0.000000e+00> : vector<16x16xf32>
    %26 = tpu.matmul %24, %25, %cst_19 {dimension_numbers = #tpu.dot_dimension_numbers<[1], [0], [0], [1], [0, 0, 1, 1], [], []>} : vector<16x48xf32>, vector<48x16xf32>, vector<16x16xf32> -> vector<16x16xf32>
    %c0_20 = arith.constant 0 : index
    %c0_21 = arith.constant 0 : index
    %27 = vector.load %arg5[%c0_20, %c0_21] : memref<1x16xf32, #tpu.memory_space<vmem>>, vector<1x16xf32>
    %28 = vector.broadcast %27 : vector<1x16xf32> to vector<16x16xf32>
    %29 = arith.addf %26, %28 : vector<16x16xf32>
    %cst_22 = arith.constant 0.000000e+00 : f32
    %30 = vector.broadcast %cst_22 : f32 to vector<16x16xf32>
    %31 = arith.maximumf %29, %30 : vector<16x16xf32>
    %c0_23 = arith.constant 0 : index
    %c0_24 = arith.constant 0 : index
    %32 = vector.load %arg6[%c0_23, %c0_24] : memref<16x8xf32, #tpu.memory_space<vmem>>, vector<16x8xf32>
    %cst_25 = arith.constant dense<0.000000e+00> : vector<16x8xf32>
    %33 = tpu.matmul %31, %32, %cst_25 {dimension_numbers = #tpu.dot_dimension_numbers<[1], [0], [0], [1], [0, 0, 1, 1], [], []>} : vector<16x16xf32>, vector<16x8xf32>, vector<16x8xf32> -> vector<16x8xf32>
    %c0_26 = arith.constant 0 : index
    %c0_27 = arith.constant 0 : index
    %34 = vector.load %arg7[%c0_26, %c0_27] : memref<1x8xf32, #tpu.memory_space<vmem>>, vector<1x8xf32>
    %35 = vector.broadcast %34 : vector<1x8xf32> to vector<16x8xf32>
    %36 = arith.addf %33, %35 : vector<16x8xf32>
    %37 = math.tanh %36 : vector<16x8xf32>
    %c0_28 = arith.constant 0 : index
    %c0_29 = arith.constant 0 : index
    %38 = vector.load %arg8[%c0_28, %c0_29] : memref<8x1xf32, #tpu.memory_space<vmem>>, vector<8x1xf32>
    %cst_30 = arith.constant dense<0.000000e+00> : vector<16x1xf32>
    %39 = tpu.matmul %37, %38, %cst_30 {dimension_numbers = #tpu.dot_dimension_numbers<[1], [0], [0], [1], [0, 0, 1, 1], [], []>} : vector<16x8xf32>, vector<8x1xf32>, vector<16x1xf32> -> vector<16x1xf32>
    %c0_31 = arith.constant 0 : index
    %c0_32 = arith.constant 0 : index
    %40 = vector.load %arg9[%c0_31, %c0_32] : memref<1x1xf32, #tpu.memory_space<vmem>>, vector<1x1xf32>
    %41 = vector.broadcast %40 : vector<1x1xf32> to vector<16x1xf32>
    %42 = arith.addf %39, %41 : vector<16x1xf32>
    %43 = vector.shape_cast %42 : vector<16x1xf32> to vector<2x8x1xf32>
    %cst_33 = arith.constant dense<0xFF800000> : vector<2x1xf32>
    %44 = vector.multi_reduction <maximumf>, %43, %cst_33 [1] : vector<2x8x1xf32> to vector<2x1xf32>
    %45 = vector.shape_cast %44 : vector<2x1xf32> to vector<2x1x1xf32>
    %46 = vector.broadcast %45 : vector<2x1x1xf32> to vector<2x8x1xf32>
    %47 = arith.subf %43, %46 : vector<2x8x1xf32>
    %48 = math.exp %47 : vector<2x8x1xf32>
    %cst_34 = arith.constant dense<0.000000e+00> : vector<2x1xf32>
    %49 = vector.multi_reduction <add>, %48, %cst_34 [1] : vector<2x8x1xf32> to vector<2x1xf32>
    %50 = vector.shape_cast %49 : vector<2x1xf32> to vector<2x1x1xf32>
    %51 = vector.broadcast %50 : vector<2x1x1xf32> to vector<2x8x1xf32>
    %52 = arith.divf %48, %51 : vector<2x8x1xf32>
    %53 = vector.shape_cast %31 : vector<16x16xf32> to vector<2x8x16xf32>
    %54 = vector.broadcast %52 : vector<2x8x1xf32> to vector<2x8x16xf32>
    %55 = arith.mulf %53, %54 : vector<2x8x16xf32>
    %cst_35 = arith.constant dense<0.000000e+00> : vector<2x16xf32>
    %56 = vector.multi_reduction <add>, %55, %cst_35 [1] : vector<2x8x16xf32> to vector<2x16xf32>
    %c0_36 = arith.constant 0 : index
    %c0_37 = arith.constant 0 : index
    %57 = vector.load %arg10[%c0_36, %c0_37] : memref<16x4xf32, #tpu.memory_space<vmem>>, vector<16x4xf32>
    %cst_38 = arith.constant dense<0.000000e+00> : vector<2x4xf32>
    %58 = tpu.matmul %56, %57, %cst_38 {dimension_numbers = #tpu.dot_dimension_numbers<[1], [0], [0], [1], [0, 0, 1, 1], [], []>} : vector<2x16xf32>, vector<16x4xf32>, vector<2x4xf32> -> vector<2x4xf32>
    %c0_39 = arith.constant 0 : index
    %c0_40 = arith.constant 0 : index
    %59 = vector.load %arg11[%c0_39, %c0_40] : memref<1x4xf32, #tpu.memory_space<vmem>>, vector<1x4xf32>
    %60 = vector.broadcast %59 : vector<1x4xf32> to vector<2x4xf32>
    %61 = arith.addf %58, %60 : vector<2x4xf32>
    %c0_41 = arith.constant 0 : index
    %c0_42 = arith.constant 0 : index
    %62 = vector.load %arg12[%c0_41, %c0_42] : memref<2x4xf32, #tpu.memory_space<vmem>>, vector<2x4xf32>
    tpu.vector_store %arg12[%c0_41, %c0_42], %61 {strides = array<i32>} : memref<2x4xf32, #tpu.memory_space<vmem>>, vector<2x4xf32>,
    return
  }
  func.func @transform_0(%arg0: i32) -> (i32, i32, i32) {
    %c0_i32 = arith.constant 0 : i32
    %c0_i32_0 = arith.constant 0 : i32
    %c0_i32_1 = arith.constant 0 : i32
    return %arg0, %c0_i32, %c0_i32_0 : i32, i32, i32
  }
  func.func @transform_1(%arg0: i32) -> (i32, i32) {
    %c0_i32 = arith.constant 0 : i32
    %c0_i32_0 = arith.constant 0 : i32
    %c0_i32_1 = arith.constant 0 : i32
    return %c0_i32, %c0_i32_0 : i32, i32
  }
  func.func @transform_2(%arg0: i32) -> (i32, i32) {
    %c0_i32 = arith.constant 0 : i32
    %c0_i32_0 = arith.constant 0 : i32
    %c0_i32_1 = arith.constant 0 : i32
    return %c0_i32, %c0_i32_0 : i32, i32
  }
  func.func @transform_3(%arg0: i32) -> (i32, i32) {
    %c0_i32 = arith.constant 0 : i32
    %c0_i32_0 = arith.constant 0 : i32
    %c0_i32_1 = arith.constant 0 : i32
    return %c0_i32, %c0_i32_0 : i32, i32
  }
  func.func @transform_4(%arg0: i32) -> (i32, i32) {
    %c0_i32 = arith.constant 0 : i32
    %c0_i32_0 = arith.constant 0 : i32
    %c0_i32_1 = arith.constant 0 : i32
    return %c0_i32, %c0_i32_0 : i32, i32
  }
  func.func @transform_5(%arg0: i32) -> (i32, i32) {
    %c0_i32 = arith.constant 0 : i32
    %c0_i32_0 = arith.constant 0 : i32
    %c0_i32_1 = arith.constant 0 : i32
    return %c0_i32, %c0_i32_0 : i32, i32
  }
  func.func @transform_6(%arg0: i32) -> (i32, i32) {
    %c0_i32 = arith.constant 0 : i32
    %c0_i32_0 = arith.constant 0 : i32
    %c0_i32_1 = arith.constant 0 : i32
    return %c0_i32, %c0_i32_0 : i32, i32
  }
  func.func @transform_7(%arg0: i32) -> (i32, i32) {
    %c0_i32 = arith.constant 0 : i32
    %c0_i32_0 = arith.constant 0 : i32
    %c0_i32_1 = arith.constant 0 : i32
    return %c0_i32, %c0_i32_0 : i32, i32
  }
  func.func @transform_8(%arg0: i32) -> (i32, i32) {
    %c0_i32 = arith.constant 0 : i32
    %c0_i32_0 = arith.constant 0 : i32
    %c0_i32_1 = arith.constant 0 : i32
    return %c0_i32, %c0_i32_0 : i32, i32
  }
  func.func @transform_9(%arg0: i32) -> (i32, i32) {
    %c0_i32 = arith.constant 0 : i32
    %c0_i32_0 = arith.constant 0 : i32
    %c0_i32_1 = arith.constant 0 : i32
    return %c0_i32, %c0_i32_0 : i32, i32
  }
  func.func @transform_10(%arg0: i32) -> (i32, i32) {
    %c0_i32 = arith.constant 0 : i32
    %c0_i32_0 = arith.constant 0 : i32
    %c0_i32_1 = arith.constant 0 : i32
    return %c0_i32, %c0_i32_0 : i32, i32
  }
  func.func @transform_11(%arg0: i32) -> (i32, i32) {
    %c0_i32 = arith.constant 0 : i32
    %c0_i32_0 = arith.constant 0 : i32
    return %arg0, %c0_i32 : i32, i32
  }
}

</mosaic_0001>

<bundles_post_ra>
// kernel: tpu_custom_call.1
= control target key start
LH: loop header
LB: loop body
LE: loop exit
PB: predicated region body
PF: predicated region fallthrough
CT: control target
= control target key end

     0   :  { %s974_s0 = inlined_call_operand.vmem [shape: f32[2,18,8], index: 0, kind: input, shape index: {}]   ;;  %s975_s1 = inlined_call_operand.vmem [shape: f32[24,16], index: 1, kind: input, shape index: {}]   ;;  %s976_s2 = inlined_call_operand.vmem [shape: f32[1,16], index: 2, kind: input, shape index: {}]   ;;  %s977_s3 = inlined_call_operand.vmem [shape: f32[48,16], index: 3, kind: input, shape index: {}]   ;;  %s978_s4 = inlined_call_operand.vmem [shape: f32[1,16], index: 4, kind: input, shape index: {}]   ;;  %s979_s5 = inlined_call_operand.vmem [shape: f32[16,8], index: 5, kind: input, shape index: {}]   ;;  %s980_s6 = inlined_call_operand.vmem [shape: f32[1,8], index: 6, kind: input, shape index: {}]   ;;  %s981_s7 = inlined_call_operand.vmem [shape: f32[8,1], index: 7, kind: input, shape index: {}]   ;;  %s982_s8 = inlined_call_operand.<no memory space> [shape: f32[1,1], index: 8, kind: input, shape index: {}]   ;;  %s983_s9 = inlined_call_operand.vmem [shape: f32[16,4], index: 9, kind: input, shape index: {}]   ;;  %s984_s10 = inlined_call_operand.vmem [shape: f32[1,4], index: 10, kind: input, shape index: {}]   ;;  %s985_s11 = inlined_call_operand.hbm [shape: f32[2,4], index: 11, kind: output, shape index: {}]  }
   0x1   :  { %v16_v0 = vstv %s982_s8 }
   0x2   :  { %17 = vst [vmem:[#allocation3] sm:$0x1] %v16_v0 }
   0x3   :  { %v41_v1 = vld [vmem:[%s974_s0] sm:$0xff]  ;;  %v778_v2 = vld [vmem:[%s974_s0 + $0x8] sm:$0xff]  ;;  %vm53_vm0 = vcmask 1046528   ;;  %v43_v3 = vld [vmem:[%s974_s0 + $0x10] sm:$0x3]  ;;  %s703_s28 = smov 8  }
   0x4   :  { %v54_v4 = vrot.slane %v41_v1, 1  ;;  %v55_v5 = vrot.slane %v778_v2, 1  ;;  %v57_v6 = vrot.slane %v43_v3, 1  ;;  %v45_v7 = vld [vmem:[%s974_s0 + $0x20] sm:$0xff]  ;;  %v77_v10 = vrot.slane %v41_v1, 2 }
   0x5   :  { %v46_v11 = vld [vmem:[%s974_s0 + $0x28] sm:$0x3]  ;;  %v60_v12 = vrot.slane %v45_v7, 1  ;;  %v78_v14 = vrot.slane %v778_v2, 2  ;;  %v80_v15 = vrot.slane %v43_v3, 2  ;;  %vm76_vm1 = vcmask 1045504  }
   0x6   :  { %v56_v8 = vsel %vm53_vm0, %v54_v4, %v55_v5  ;;  %v58_v9 = vsel %vm53_vm0, %v55_v5, %v57_v6  ;;  %v62_v13 = vrot.slane %v46_v11, 1 }
   0x7   :  { %64 = vrot.lane.b32.xlu0 %v56_v8, %s703_s28  ;;  %66 = vrot.lane.b32.xlu1 %v58_v9, %s703_s28 }
   0x8   :  { %v63_v16 = vsel %vm53_vm0, %v60_v12, %v62_v13 }
   0x9   :  { %18 = vsyncpa [#allocation5], 0  ;;  %70 = vrot.lane.b32.xlu2 %v63_v16, %s703_s28  ;;  %v85_v17 = vrot.slane %v46_v11, 2  ;;  %v79_v18 = vsel %vm76_vm1, %v77_v10, %v78_v14  ;;  %v81_v19 = vsel %vm76_vm1, %v78_v14, %v80_v15  ;;  %v44_v20 = vld [vmem:[%s974_s0 + $0x18] sm:$0xff]  ;;  %v83_v21 = vrot.slane %v45_v7, 2  ;;  %s704_s12 = smov 16  }
   0xa   :  { %v59_v23 = vrot.slane %v44_v20, 1  ;;  %v82_v24 = vrot.slane %v44_v20, 2  ;;  %v111_v27 = vld [vmem:[%s975_s1 + $0x10] sm:$0xff]  ;;  %v110_v28 = vld [vmem:[%s975_s1 + $0x8] sm:$0xff]  ;;  %v109_v29 = vld [vmem:[%s975_s1] sm:$0xff]  ;;  %vm99_vm2 = vcmask 64512  }
   0xb   :  { %v86_v22 = vsel %vm76_vm1, %v83_v21, %v85_v17  ;;  %142 = vmatpush.msra.mxu0 %v111_v27  ;;  %649 = vmatpush.msra.mxu2 %v111_v27  ;;  %vm104_vm3 = vcmask 130048   ;;  %vm116_vm4 = vcmask 195584   ;;  %v831_v47 = vld [vmem:[%s976_s2] ss:$0 sm:$0xff]  ;;  %vm190_vm5 = vcmask 123904   ;;  %s706_s2 = smov 32  }
   0xc   :  { %v61_v25 = vsel %vm53_vm0, %v59_v23, %v60_v12  ;;  %v84_v26 = vsel %vm76_vm1, %v82_v24, %v83_v21  ;;  %v705_v52 = vmov 0.0   ;;  %vm323_vm6 = vcmask 1041409   ;;  %s629_s22 = sshll.u32 %s985_s11, 4  ;;  %s630_s22 = int_to_ptr.hbm [resolvable:$true] %s629_s22 }
   0xd   :  { %143 = vmatpush.msra.mxu0 %v110_v28  ;;  %650 = vmatpush.msra.mxu2 %v110_v28  ;;  %303 = vst.msk [vmem:[#allocation2] sm:$0xff] %vm104_vm3, %v705_v52  ;;  %vm325_vm7 = vcmask 1042434   ;;  %vm327_vm8 = vcmask 1043459   ;;  %vm329_vm9 = vcmask 1044484   ;;  %vm331_vm10 = vcmask 1045509  }
   0xe   :  { %304 = vst.msk [vmem:[#allocation2 + $0x8] sm:$0x3] %vm190_vm5, %v705_v52  ;;  %vm333_vm11 = vcmask 1046534   ;;  %vm335_vm12 = vcmask 1047559   ;;  %vm382_vm13 = vcmask 261120   ;;  %vm395_vm14 = vcmask 392192  }
   0xf   :  { %87 = vrot.lane.b32.xlu0 %v79_v18, %s704_s12  ;;  %89 = vrot.lane.b32.xlu1 %v81_v19, %s704_s12  ;;  %305 = vst.msk [vmem:[#allocation2 + $0x10] sm:$0xff] %vm104_vm3, %v705_v52  ;;  %vm498_vm15 = vcmask 7168  }
  0x10   :  { %144 = vmatpush.msra.mxu0 %v109_v29  ;;  %651 = vmatpush.msra.mxu2 %v109_v29  ;;  %306 = vst.msk [vmem:[#allocation2 + $0x18] sm:$0x3] %vm190_vm5, %v705_v52 }
  0x11   :  { %93 = vrot.lane.b32.xlu2 %v86_v22, %s704_s12 }
  0x17   :  { %68 = vrot.lane.b32.xlu0 %v61_v25, %s703_s28  ;;  %91 = vrot.lane.b32.xlu1 %v84_v26, %s704_s12 }
  0x63   :  { %v71_v30 = vpop.permute.xlu2 %70 }
  0x64   :  { %v103_v31 = vsel %vm99_vm2, %v45_v7, %v71_v30 }
  0x6b   :  { %v94_v32 = vpop.permute.xlu2 %93 }
  0x6c   :  { %v108_v33 = vsel %vm104_vm3, %v103_v31, %v94_v32 }
  0x6d   :  { %641 = vmatmul.msk.f32.vlgmr.msra.gmra.mxu2 %vm116_vm4, %v108_v33 }
  0x79   :  { %v65_v34 = vpop.permute.xlu0 %64  ;;  %v67_v35 = vpop.permute.xlu1 %66 }
  0x7a   :  { %v100_v36 = vsel %vm99_vm2, %v41_v1, %v65_v34  ;;  %v101_v40 = vsel %vm99_vm2, %v778_v2, %v67_v35 }
  0x81   :  { %v88_v37 = vpop.permute.xlu0 %87  ;;  %v90_v39 = vpop.permute.xlu1 %89 }
  0x82   :  { %v105_v38 = vsel %vm104_vm3, %v100_v36, %v88_v37  ;;  %v106_v41 = vsel %vm104_vm3, %v101_v40, %v90_v39 }
  0x83   :  { %638 = vmatmul.msk.f32.vlgmr.msra.gmra.mxu0 %vm116_vm4, %v105_v38 }
  0x89   :  { %v69_v42 = vpop.permute.xlu0 %68  ;;  %v92_v44 = vpop.permute.xlu1 %91 }
  0x8a   :  { %v102_v43 = vsel %vm99_vm2, %v44_v20, %v69_v42 }
  0x8b   :  { %639 = vmatmul.msk.f32.gmra.mxu0 %vm116_vm4, %v106_v41  ;;  %v107_v45 = vsel %vm104_vm3, %v102_v43, %v92_v44 }
  0x93   :  { %640 = vmatmul.msk.f32.gmra.mxu0 %vm116_vm4, %v107_v45 }
  0xf0   :  { %v155_v46 = vpop.f32.mrf.mxu2 }
  0xf1   :  { %v156_v48 = vadd.f32 %v831_v47, %v155_v46 }
  0xf3   :  { %v161_v49 = vmax.f32 %v156_v48, 0.0 }
  0xf5   :  { %v175_v50 = vrot.slane %v161_v49, 2  ;;  %v275_v51 = vsel %vm190_vm5, %v161_v49, -inf  ;;  %v176_v53 = vrot.slane %v161_v49, 4  ;;  %v177_v54 = vrot.slane %v161_v49, 6 }
  0xf6   :  { %v276_v56 = vrot.slane %v275_v51, 4 }
  0xf7   :  { %v282_v57 = vsel %vm190_vm5, %v175_v50, -inf  ;;  %v289_v61 = vsel %vm190_vm5, %v176_v53, -inf  ;;  %v296_v62 = vsel %vm190_vm5, %v177_v54, -inf }
  0xf8   :  { %v283_v60 = vrot.slane %v282_v57, 4  ;;  %v843_v63 = vmax.f32 %v275_v51, %v276_v56  ;;  %v290_v5 = vrot.slane %v289_v61, 4  ;;  %v297_v6 = vrot.slane %v296_v62, 4 }
  0xfa   :  { %v849_v10 = vmax.f32 %v282_v57, %v283_v60  ;;  %v278_v16 = vrot.slane %v843_v63, 2  ;;  %v854_v23 = vmax.f32 %v289_v61, %v290_v5  ;;  %v856_v24 = vmax.f32 %v296_v62, %v297_v6 }
  0xfc   :  { %v285_v22 = vrot.slane %v849_v10, 2  ;;  %v292_v45 = vrot.slane %v854_v23, 2 }
 0x100   :  { %v146_v55 = vpop.f32.mrf.mxu0 }
 0x101   :  { %v147_v58 = vadd.f32 %v831_v47, %v146_v55 }
 0x103   :  { %v158_v59 = vmax.f32 %v147_v58, 0.0 }
 0x105   :  { %v166_v0 = vrot.slane %v158_v59, 2  ;;  %v167_v1 = vrot.slane %v158_v59, 4  ;;  %v168_v2 = vrot.slane %v158_v59, 6  ;;  %v191_v3 = vsel %vm190_vm5, %v158_v59, -inf }
 0x106   :  { %v192_v4 = vrot.slane %v191_v3, 4 }
 0x107   :  { %v198_v7 = vsel %vm190_vm5, %v166_v0, -inf  ;;  %v205_v8 = vsel %vm190_vm5, %v167_v1, -inf  ;;  %v212_v9 = vsel %vm190_vm5, %v168_v2, -inf }
 0x108   :  { %v193_v11 = vmax.f32 %v191_v3, %v192_v4  ;;  %v199_v12 = vrot.slane %v198_v7, 4  ;;  %v206_v13 = vrot.slane %v205_v8, 4  ;;  %v213_v14 = vrot.slane %v212_v9, 4  ;;  %v149_v15 = vpop.f32.mrf.mxu0 }
 0x109   :  { %v150_v17 = vadd.f32 %v831_v47, %v149_v15 }
 0x10a   :  { %v194_v18 = vrot.slane %v193_v11, 2  ;;  %v200_v19 = vmax.f32 %v198_v7, %v199_v12  ;;  %v207_v20 = vmax.f32 %v205_v8, %v206_v13  ;;  %v214_v21 = vmax.f32 %v212_v9, %v213_v14 }
 0x10b   :  { %v159_v25 = vmax.f32 %v150_v17, 0.0 }
 0x10c   :  { %v195_v26 = vmax.f32 %v193_v11, %v194_v18  ;;  %v201_v27 = vrot.slane %v200_v19, 2  ;;  %v208_v28 = vrot.slane %v207_v20, 2  ;;  %v215_v29 = vrot.slane %v214_v21, 2 }
 0x10d   :  { %v169_v30 = vrot.slane %v159_v25, 2  ;;  %v170_v31 = vrot.slane %v159_v25, 4  ;;  %v171_v32 = vrot.slane %v159_v25, 6  ;;  %v219_v33 = vsel %vm190_vm5, %v159_v25, -inf }
 0x10e   :  { %v196_v34 = vrot.slane %v195_v26, 1  ;;  %v202_v35 = vmax.f32 %v200_v19, %v201_v27  ;;  %v209_v36 = vmax.f32 %v207_v20, %v208_v28  ;;  %v216_v37 = vmax.f32 %v214_v21, %v215_v29 }
 0x10f   :  { %v220_v38 = vrot.slane %v219_v33, 4  ;;  %v226_v39 = vsel %vm190_vm5, %v169_v30, -inf  ;;  %v233_v40 = vsel %vm190_vm5, %v170_v31, -inf  ;;  %v240_v41 = vsel %vm190_vm5, %v171_v32, -inf }
 0x110   :  { %v203_v42 = vrot.slane %v202_v35, 1  ;;  %v210_v43 = vrot.slane %v209_v36, 1  ;;  %v217_v44 = vrot.slane %v216_v37, 1  ;;  %v152_v46 = vpop.f32.mrf.mxu0  ;;  %v227_v49 = vrot.slane %v226_v39, 4 }
 0x111   :  { %v221_v48 = vmax.f32 %v219_v33, %v220_v38  ;;  %v234_v50 = vrot.slane %v233_v40, 4  ;;  %v241_v51 = vrot.slane %v240_v41, 4  ;;  %v197_v52 = vmax.f32 %v195_v26, %v196_v34 }
 0x112   :  { %v204_v53 = vmax.f32 %v202_v35, %v203_v42  ;;  %v211_v54 = vmax.f32 %v209_v36, %v210_v43  ;;  %v153_v55 = vadd.f32 %v831_v47, %v152_v46  ;;  %v228_v57 = vmax.f32 %v226_v39, %v227_v49 }
 0x113   :  { %v222_v56 = vrot.slane %v221_v48, 2  ;;  %v235_v58 = vmax.f32 %v233_v40, %v234_v50  ;;  %v242_v59 = vmax.f32 %v240_v41, %v241_v51  ;;  %v218_v60 = vmax.f32 %v216_v37, %v217_v44 }
 0x114   :  { %v324_v61 = vsel %vm323_vm6, %v204_v53, %v197_v52  ;;  %v160_v62 = vmax.f32 %v153_v55, 0.0  ;;  %v229_v2 = vrot.slane %v228_v57, 2  ;;  %v299_v35 = vrot.slane %v856_v24, 2 }
 0x115   :  { %v326_v0 = vsel %vm325_vm7, %v211_v54, %v324_v61  ;;  %v223_v1 = vmax.f32 %v221_v48, %v222_v56  ;;  %v236_v3 = vrot.slane %v235_v58, 2  ;;  %v243_v5 = vrot.slane %v242_v59, 2 }
 0x116   :  { %v328_v4 = vsel %vm327_vm8, %v218_v60, %v326_v0  ;;  %v172_v6 = vrot.slane %v160_v62, 2  ;;  %v173_v7 = vrot.slane %v160_v62, 4  ;;  %v230_v8 = vmax.f32 %v228_v57, %v229_v2 }
 0x117   :  { %v224_v47 = vrot.slane %v223_v1, 1  ;;  %v237_v9 = vmax.f32 %v235_v58, %v236_v3  ;;  %v174_v11 = vrot.slane %v160_v62, 6  ;;  %v244_v12 = vmax.f32 %v242_v59, %v243_v5 }
 0x118   :  { %v247_v13 = vsel %vm190_vm5, %v160_v62, -inf  ;;  %v254_v14 = vsel %vm190_vm5, %v172_v6, -inf  ;;  %v261_v15 = vsel %vm190_vm5, %v173_v7, -inf  ;;  %v231_v18 = vrot.slane %v230_v8, 1 }
 0x119   :  { %v225_v17 = vmax.f32 %v223_v1, %v224_v47  ;;  %v238_v19 = vrot.slane %v237_v9, 1  ;;  %v248_v20 = vrot.slane %v247_v13, 4  ;;  %v245_v21 = vrot.slane %v244_v12, 1 }
 0x11a   :  { %v255_v25 = vrot.slane %v254_v14, 4  ;;  %v262_v26 = vrot.slane %v261_v15, 4  ;;  %v268_v27 = vsel %vm190_vm5, %v174_v11, -inf  ;;  %v232_v28 = vmax.f32 %v230_v8, %v231_v18 }
 0x11b   :  { %v239_v29 = vmax.f32 %v237_v9, %v238_v19  ;;  %v330_v30 = vsel %vm329_vm9, %v225_v17, %v328_v4  ;;  %v249_v31 = vmax.f32 %v247_v13, %v248_v20  ;;  %v269_v34 = vrot.slane %v268_v27, 4 }
 0x11c   :  { %v256_v32 = vmax.f32 %v254_v14, %v255_v25  ;;  %v263_v33 = vmax.f32 %v261_v15, %v262_v26  ;;  %v246_v36 = vmax.f32 %v244_v12, %v245_v21  ;;  %v332_v37 = vsel %vm331_vm10, %v232_v28, %v330_v30  ;;  %v390_v28 = vld [vmem:[%s977_s3 + $0x28] sm:$0xff]  ;;  %v388_v30 = vld [vmem:[%s977_s3 + $0x18] sm:$0xff] }
 0x11d   :  { %v250_v38 = vrot.slane %v249_v31, 2  ;;  %v334_v39 = vsel %vm333_vm11, %v239_v29, %v332_v37  ;;  %v270_v42 = vmax.f32 %v268_v27, %v269_v34  ;;  %v279_v43 = vmax.f32 %v843_v63, %v278_v16  ;;  %v389_v29 = vld [vmem:[%s977_s3 + $0x20] sm:$0xff]  ;;  %412 = vmatpush.msra.mxu1 %v390_v28 }
 0x11e   :  { %v257_v40 = vrot.slane %v256_v32, 2  ;;  %v264_v41 = vrot.slane %v263_v33, 2  ;;  %v286_v44 = vmax.f32 %v849_v10, %v285_v22  ;;  %v336_v46 = vsel %vm335_vm12, %v246_v36, %v334_v39 }
 0x11f   :  { %v251_v48 = vmax.f32 %v249_v31, %v250_v38  ;;  %346 = vst.msk [vmem:[#allocation2 + $0x1] sm:$0xff] %vm104_vm3, %v336_v46  ;;  %v271_v51 = vrot.slane %v270_v42, 2  ;;  %v293_v52 = vmax.f32 %v854_v23, %v292_v45  ;;  %v300_v54 = vmax.f32 %v856_v24, %v299_v35  ;;  %413 = vmatpush.msra.mxu1 %v389_v29  ;;  %v387_v31 = vld [vmem:[%s977_s3 + $0x10] sm:$0xff] }
 0x120   :  { %v258_v49 = vmax.f32 %v256_v32, %v257_v40  ;;  %v265_v50 = vmax.f32 %v263_v33, %v264_v41  ;;  %v280_v56 = vrot.slane %v279_v43, 1  ;;  %v287_v10 = vrot.slane %v286_v44, 1  ;;  %v386_v32 = vld [vmem:[%s977_s3 + $0x8] sm:$0xff]  ;;  %v385_v33 = vld [vmem:[%s977_s3] sm:$0xff] }
 0x121   :  { %v252_v53 = vrot.slane %v251_v48, 1  ;;  %v272_v55 = vmax.f32 %v270_v42, %v271_v51  ;;  %v294_v60 = vrot.slane %v293_v52, 1  ;;  %v301_v61 = vrot.slane %v300_v54, 1  ;;  %414 = vmatpush.msra.mxu1 %v388_v30  ;;  %v428_v42 = vld [vmem:[%s979_s5 + $0x8] sm:$0xff] }
 0x122   :  { %v259_v63 = vrot.slane %v258_v49, 1  ;;  %v266_v16 = vrot.slane %v265_v50, 1  ;;  %v281_v1 = vmax.f32 %v279_v43, %v280_v56  ;;  %v288_v2 = vmax.f32 %v286_v44, %v287_v10  ;;  %v427_v43 = vld [vmem:[%s979_s5] sm:$0xff]  ;;  %453 = vmatpush.msrb.mxu2 %v428_v42 }
 0x123   :  { %v253_v22 = vmax.f32 %v251_v48, %v252_v53  ;;  %v273_v59 = vrot.slane %v272_v55, 1  ;;  %v295_v7 = vmax.f32 %v293_v52, %v294_v60  ;;  %v302_v9 = vmax.f32 %v300_v54, %v301_v61  ;;  %415 = vmatpush.msra.mxu1 %v387_v31  ;;  %v661_v44 = vld [vmem:[%s978_s4] ss:$0 sm:$0xff] }
 0x124   :  { %v260_v57 = vmax.f32 %v258_v49, %v259_v63  ;;  %v267_v58 = vmax.f32 %v265_v50, %v266_v16  ;;  %454 = vmatpush.msrb.mxu2 %v427_v43  ;;  %v464_v53 = vld [vmem:[%s981_s7] sm:$0xff] }
 0x125   :  { %v274_v62 = vmax.f32 %v272_v55, %v273_v59  ;;  %416 = vmatpush.msra.mxu1 %v386_v32  ;;  %490 = vmatpush.msra.mxu3 %v464_v53  ;;  %v662_v54 = vld [vmem:[%s980_s6] ss:$0 sm:$0xff] }
 0x126   :  { %v337_v0 = vsel %vm323_vm6, %v260_v57, %v253_v22  ;;  %v348_v45 = vld [vmem:[#allocation2] sm:$0xff]  ;;  %v349_v24 = vld [vmem:[#allocation2 + $0x8] sm:$0x3] }
 0x127   :  { %v338_v23 = vsel %vm325_vm7, %v267_v58, %v337_v0  ;;  %v368_v4 = vrot.slane %v348_v45, 2  ;;  %v369_v5 = vrot.slane %v349_v24, 2  ;;  %v356_v6 = vrot.slane %v348_v45, 1  ;;  %417 = vmatpush.msra.mxu1 %v385_v33  ;;  %v663_v57 = vld [vmem:[#allocation3] ss:$0 sm:$0xff] }
 0x128   :  { %v339_v3 = vsel %vm327_vm8, %v274_v62, %v338_v23  ;;  %v357_v8 = vrot.slane %v349_v24, 1 }
 0x129   :  { %v340_v47 = vsel %vm329_vm9, %v281_v1, %v339_v3  ;;  %v370_v12 = vsel %vm76_vm1, %v368_v4, %v369_v5 }
 0x12a   :  { %v341_v11 = vsel %vm331_vm10, %v288_v2, %v340_v47  ;;  %374 = vrot.lane.b32.xlu0 %v370_v12, %s706_s2  ;;  %v358_v14 = vsel %vm53_vm0, %v356_v6, %v357_v8  ;;  %v707_v8 = vmov 0   ;;  %vm620_vm10 = vcmask 25600  }
 0x12b   :  { %v342_v13 = vsel %vm333_vm11, %v295_v7, %v341_v11  ;;  %362 = vrot.lane.b32.xlu2 %v358_v14, %s704_s12  ;;  %658 = vset.pattern.permute.xlu0 %v707_v8 }
 0x12c   :  { %v343_v15 = vsel %vm335_vm12, %v302_v9, %v342_v13  ;;  %659 = vset.pattern.permute.xlu1 %v707_v8 }
 0x12d   :  { %347 = vst.msk [vmem:[#allocation2 + $0x11] sm:$0xff] %vm104_vm3, %v343_v15 }
 0x134   :  { %v350_v17 = vld [vmem:[#allocation2 + $0x10] sm:$0xff]  ;;  %v351_v18 = vld [vmem:[#allocation2 + $0x18] sm:$0x3] }
 0x135   :  { %v371_v19 = vrot.slane %v350_v17, 2  ;;  %v372_v20 = vrot.slane %v351_v18, 2  ;;  %v359_v21 = vrot.slane %v350_v17, 1  ;;  %v360_v25 = vrot.slane %v351_v18, 1 }
 0x137   :  { %v373_v26 = vsel %vm76_vm1, %v371_v19, %v372_v20  ;;  %v361_v27 = vsel %vm53_vm0, %v359_v21, %v360_v25 }
 0x138   :  { %376 = vrot.lane.b32.xlu2 %v373_v26, %s706_s2  ;;  %364 = vrot.lane.b32.xlu1 %v361_v27, %s704_s12  ;;  %s708_s2 = smov [#allocation4]  }
 0x139   :  { %s627_s19 = sshll.u32 %s708_s2, 4  ;;  %s628_s19 = int_to_ptr.vmem [resolvable:$true] %s627_s19 }
 0x185   :  { %v363_v34 = vpop.permute.xlu2 %362 }
 0x186   :  { %v380_v35 = vsel %vm104_vm3, %v348_v45, %v363_v34 }
 0x192   :  { %v377_v39 = vpop.permute.xlu2 %376 }
 0x19c   :  { %v375_v36 = vpop.permute.xlu0 %374 }
 0x19d   :  { %v383_v37 = vsel %vm382_vm13, %v380_v35, %v375_v36 }
 0x19e   :  { %642 = vmatmul.msk.f32.vlgmr.msra.gmra.mxu1 %vm395_vm14, %v383_v37 }
 0x1aa   :  { %v365_v38 = vpop.permute.xlu1 %364 }
 0x1ab   :  { %v381_v40 = vsel %vm104_vm3, %v350_v17, %v365_v38 }
 0x1ac   :  { %v384_v41 = vsel %vm382_vm13, %v381_v40, %v377_v39 }
 0x1ad   :  { %643 = vmatmul.msk.f32.gmra.mxu1 %vm395_vm14, %v384_v41 }
 0x21b   :  { %v419_v46 = vpop.f32.mrf.mxu1 }
 0x21c   :  { %v930_v48 = vadd.f32 %v661_v44, %v419_v46 }
 0x21e   :  { %v425_v49 = vmax.f32 %v930_v48, 0.0 }
 0x220   :  { %644 = vmatmul.msk.f32.vlgmr.msrb.gmra.mxu2 %vm104_vm3, %v425_v49 }
 0x22a   :  { %v422_v50 = vpop.f32.mrf.mxu1 }
 0x22b   :  { %v936_v51 = vadd.f32 %v661_v44, %v422_v50 }
 0x22d   :  { %v426_v52 = vmax.f32 %v936_v51, 0.0  ;;  %v664_v51 = vld [vmem:[%s984_s10] ss:$0 sm:$0xff] }
 0x22f   :  { %645 = vmatmul.msk.f32.gmra.mxu2 %vm104_vm3, %v426_v52 }
 0x2a3   :  { %v456_v63 = vpop.f32.mrf.mxu2 }
 0x2a4   :  { %v457_v16 = vadd.f32 %v662_v54, %v456_v63 }
 0x2a6   :  { %665 = vtanh.f32 %v457_v16 }
 0x2ac   :  { %v666_v55 = vpop.eup %665 }
 0x2ad   :  { %646 = vmatmul.msk.f32.vlgmr.msra.gmra.mxu3 %vm99_vm2, %v666_v55 }
 0x2b2   :  { %v459_v56 = vpop.f32.mrf.mxu2 }
 0x2b3   :  { %v460_v10 = vadd.f32 %v662_v54, %v459_v56 }
 0x2b5   :  { %667 = vtanh.f32 %v460_v10 }
 0x2bb   :  { %v668_v22 = vpop.eup %667 }
 0x2bc   :  { %647 = vmatmul.msk.f32.gmra.mxu3 %vm99_vm2, %v668_v22 }
 0x330   :  { %v492_v58 = vpop.f32.mrf.mxu3 }
 0x331   :  { %v493_v59 = vadd.f32 %v663_v57, %v492_v58 }
 0x333   :  { %v499_v60 = vsel %vm498_vm15, %v493_v59, -inf }
 0x334   :  { %v500_v61 = vrot.slane %v499_v60, 4 }
 0x336   :  { %v501_v62 = vmax.f32 %v499_v60, %v500_v61  ;;  %v589_v60 = vld [vmem:[%s983_s9] sm:$0xff] }
 0x338   :  { %v502_v0 = vrot.slane %v501_v62, 2 }
 0x33a   :  { %v503_v1 = vmax.f32 %v501_v62, %v502_v0 }
 0x33c   :  { %v504_v2 = vrot.slane %v503_v1, 1 }
 0x33e   :  { %v505_v23 = vmax.f32 %v503_v1, %v504_v2 }
 0x33f   :  { %v495_v45 = vpop.f32.mrf.mxu3 }
 0x340   :  { %v496_v24 = vadd.f32 %v663_v57, %v495_v45  ;;  %v513_v3 = vsub.f32 %v493_v59, %v505_v23  ;;  %v590_v59 = vld [vmem:[%s983_s9 + $0x8] sm:$0xff] }
 0x341   :  { %614 = vmatpush.msrb.mxu3 %v590_v59 }
 0x342   :  { %v506_v4 = vsel %vm498_vm15, %v496_v24, -inf  ;;  %v515_v5 = vmul.f32 1.442695, %v513_v3 }
 0x343   :  { %v507_v6 = vrot.slane %v506_v4, 4  ;;  %615 = vmatpush.msrb.mxu3 %v589_v60 }
 0x344   :  { %669 = vpow2.f32 %v515_v5 }
 0x345   :  { %v508_v7 = vmax.f32 %v506_v4, %v507_v6 }
 0x347   :  { %v509_v47 = vrot.slane %v508_v7, 2 }
 0x349   :  { %v510_v9 = vmax.f32 %v508_v7, %v509_v47 }
 0x34a   :  { %v670_v11 = vpop.eup %669 }
 0x34b   :  { %v511_v12 = vrot.slane %v510_v9, 1  ;;  %v519_v13 = vsel %vm498_vm15, %v670_v11, 0.0 }
 0x34c   :  { %v520_v14 = vrot.slane %v519_v13, 4 }
 0x34d   :  { %v512_v15 = vmax.f32 %v510_v9, %v511_v12 }
 0x34e   :  { %v521_v17 = vadd.f32 %v520_v14, %v519_v13 }
 0x34f   :  { %v514_v18 = vsub.f32 %v496_v24, %v512_v15 }
 0x350   :  { %v522_v19 = vrot.slane %v521_v17, 2 }
 0x351   :  { %v517_v20 = vmul.f32 1.442695, %v514_v18 }
 0x352   :  { %v523_v21 = vadd.f32 %v522_v19, %v521_v17 }
 0x353   :  { %671 = vpow2.f32 %v517_v20 }
 0x354   :  { %v524_v25 = vrot.slane %v523_v21, 1 }
 0x356   :  { %v525_v26 = vadd.f32 %v524_v25, %v523_v21 }
 0x358   :  { %673 = vrcp.f32 %v525_v26  ;;  %v544_v37 = vand.u32 2147483648, %v525_v26  ;;  %v542_v39 = vand.u32 2147483647, %v525_v26  ;;  %vm538_vm1 = vweird.f32 %v525_v26 }
 0x359   :  { %v672_v27 = vpop.eup %671 }
 0x35a   :  { %v526_v28 = vsel %vm498_vm15, %v672_v27, 0.0  ;;  %v545_v42 = vor.u32 1.1754944e-38, %v544_v37  ;;  %vm543_vm4 = vcmp.eq.f32.partialorder %v542_v39, 8.507059e+37 }
 0x35b   :  { %v527_v29 = vrot.slane %v526_v28, 4 }
 0x35d   :  { %v528_v30 = vadd.f32 %v527_v29, %v526_v28 }
 0x35e   :  { %v674_v31 = vpop.eup %673 }
 0x35f   :  { %v529_v32 = vrot.slane %v528_v30, 2  ;;  %v534_v33 = vmul.f32 %v674_v31, %v525_v26  ;;  %vm539_vm0 = vweird.f32 %v674_v31 }
 0x360   :  { %vm540_vm2 = vmor %vm538_vm1, %vm539_vm0 }
 0x361   :  { %v530_v34 = vadd.f32 %v529_v32, %v528_v30  ;;  %v535_v35 = vsub.f32 1.0, %v534_v33 }
 0x363   :  { %v531_v36 = vrot.slane %v530_v34, 1  ;;  %v536_v38 = vmul.f32 %v674_v31, %v535_v35 }
 0x365   :  { %v532_v40 = vadd.f32 %v531_v36, %v530_v34  ;;  %v537_v41 = vadd.f32 %v674_v31, %v536_v38 }
 0x367   :  { %675 = vrcp.f32 %v532_v40  ;;  %v541_v43 = vsel %vm540_vm2, %v674_v31, %v537_v41  ;;  %v559_v63 = vand.u32 2147483648, %v532_v40  ;;  %v557_v55 = vand.u32 2147483647, %v532_v40 }
 0x368   :  { %v546_v44 = vsel %vm543_vm4, %v545_v42, %v541_v43  ;;  %vm553_vm7 = vweird.f32 %v532_v40 }
 0x369   :  { %v547_v46 = vmul.f32 %v670_v11, %v546_v44  ;;  %v560_v10 = vor.u32 1.1754944e-38, %v559_v63  ;;  %vm558_vm9 = vcmp.eq.f32.partialorder %v557_v55, 8.507059e+37 }
 0x36b   :  { %565 = vperm.xlu0 %658, %v547_v46  }
 0x36d   :  { %v676_v50 = vpop.eup %675 }
 0x36e   :  { %v549_v53 = vmul.f32 %v676_v50, %v532_v40  ;;  %vm554_vm5 = vweird.f32 %v676_v50 }
 0x36f   :  { %vm555_vm8 = vmor %vm553_vm7, %vm554_vm5 }
 0x370   :  { %v550_v54 = vsub.f32 1.0, %v549_v53 }
 0x372   :  { %v551_v16 = vmul.f32 %v676_v50, %v550_v54 }
 0x374   :  { %v552_v56 = vadd.f32 %v676_v50, %v551_v16 }
 0x376   :  { %v556_v22 = vsel %vm555_vm8, %v676_v50, %v552_v56 }
 0x377   :  { %v561_v57 = vsel %vm558_vm9, %v560_v10, %v556_v22 }
 0x378   :  { %v562_v58 = vmul.f32 %v672_v27, %v561_v57 }
 0x37a   :  { %570 = vperm.xlu1 %659, %v562_v58  }
 0x3dd   :  { %v566_v61 = vpop.permute.xlu0 %565 }
 0x3de   :  { %v573_v62 = vmul.f32 %v566_v61, %v425_v49 }
 0x3e0   :  { %v575_v0 = vsel %vm104_vm3, %v573_v62, 0.0 }
 0x3e1   :  { %v576_v1 = vrot.slane %v575_v0, 4 }
 0x3e3   :  { %v577_v2 = vadd.f32 %v576_v1, %v575_v0 }
 0x3e5   :  { %v578_v24 = vrot.slane %v577_v2, 2 }
 0x3e7   :  { %v579_v5 = vadd.f32 %v578_v24, %v577_v2 }
 0x3e9   :  { %v580_v47 = vrot.slane %v579_v5, 1 }
 0x3eb   :  { %v581_v48 = vadd.f32 %v580_v47, %v579_v5 }
 0x3ec   :  { %v571_v23 = vpop.permute.xlu1 %570 }
 0x3ed   :  { %v574_v45 = vmul.f32 %v571_v23, %v426_v52 }
 0x3ef   :  { %v582_v3 = vsel %vm104_vm3, %v574_v45, 0.0 }
 0x3f0   :  { %v583_v4 = vrot.slane %v582_v3, 4 }
 0x3f2   :  { %v584_v6 = vadd.f32 %v583_v4, %v582_v3 }
 0x3f4   :  { %v585_v7 = vrot.slane %v584_v6, 2 }
 0x3f6   :  { %v586_v8 = vadd.f32 %v585_v7, %v584_v6 }
 0x3f8   :  { %v587_v9 = vrot.slane %v586_v8, 1 }
 0x3fa   :  { %v588_v49 = vadd.f32 %v587_v9, %v586_v8 }
 0x3fc   :  { %v597_v11 = vsel %vm323_vm6, %v588_v49, %v581_v48 }
 0x3fd   :  { %648 = vmatmul.msk.f32.vlgmr.msrb.gmra.mxu3 %vm104_vm3, %v597_v11 }
 0x480   :  { %v617_v52 = vpop.f32.mrf.mxu3 }
 0x481   :  { %v618_v12 = vadd.f32 %v664_v51, %v617_v52 }
 0x483   :  { %621 = vst.msk [vmem:[#allocation4] sm:$0x3] %vm620_vm10, %v618_v12 }
 0x484   :  { %632 = dma.vmem_to_hbm [thread:$0]  %s628_s19, 32, %s630_s22, [#allocation5]  }
 0x485   :  { %701 = dma.done.wait [#allocation5], 32  }
 0x486   :  { %702 = vsyncadd [#allocation5], 4294967264 }
 0x487   :  { %637 = vsyncpa [#allocation5], 1 }

</bundles_post_ra>
